<compile_context>
chip_gen: v5e
topology: v5e:2x2
jax: 0.10.0
libtpu: 0.0.40
codegen_flags: <defaults>
</compile_context>

<pallas_src>
import math
import functools

import jax
import jax.numpy as jnp
from jax.experimental import pallas as pl
from jax.experimental.pallas import tpu as pltpu


# --------------------------------------------------------------------------
# helpers
# --------------------------------------------------------------------------
def _round_up(a: int, b: int) -> int:
    return ((a + b - 1) // b) * b


def _sublane(dtype) -> int:
    """Packed sublane multiple for a dtype: 8 (f32), 16 (bf16), 32 (int8/fp8)."""
    itemsize = jnp.dtype(dtype).itemsize
    return max(8, 32 // max(1, itemsize))


def _pick_tile(dim: int, preferred: int, align: int) -> int:
    """Pick a tile size <= preferred (multiple of `align`) minimizing padding."""
    preferred = _round_up(max(preferred, align), align)
    if dim <= preferred:
        return _round_up(dim, align)
    best_t, best_pad = None, None
    t = preferred
    floor = max(align, preferred // 8)
    while t >= floor:
        if t % align == 0:
            padded = _round_up(dim, t)
            if best_pad is None or padded < best_pad:
                best_t, best_pad = t, padded
        t //= 2
    return best_t if best_t is not None else preferred


def _default_tile_prefs(dtype):
    """(tm, tn, tk) preferred tiles per TPU generation / dtype.

    Chosen so arithmetic intensity 2/(itemsize*(1/tm+1/tn)) sits above the
    HBM/MXU crossover (~240 v5e, ~650 v6e, ~310 v7x flops/byte) while the
    double-buffered pipeline footprint stays within scoped VMEM (and within
    v7x's 64 MiB physical VMEM per TensorCore).
    """
    itemsize = jnp.dtype(dtype).itemsize
    kind = ""
    try:
        kind = jax.devices()[0].device_kind.lower()
    except Exception:
        pass
    if itemsize <= 2 and "v6" in kind:
        # bf16 on v6e: ~683 flops/byte, ~22 MiB pipeline -> fits 32 MiB scoped.
        return 1024, 2048, 512
    # v7x / v5e / f32 everywhere: ~341 (bf16) / ~171 (f32) flops/byte,
    # ~6-12 MiB pipeline footprint -> safe on every generation.
    return 512, 1024, 512


def _vmem_limit_bytes(tm, tn, tk, x_item, w_item, o_item, multi_k) -> int:
    fp = 2 * (tm * tk * x_item + tk * tn * w_item + tm * tn * o_item)
    if multi_k:
        fp += tm * tn * 4  # f32 accumulator scratch
    return max(32 << 20, int(1.35 * fp))


# --------------------------------------------------------------------------
# kernels
# --------------------------------------------------------------------------
def _linear_kernel(x_ref, w_ref, o_ref, acc_ref):
    """One (tm, tn) output tile accumulated over the K grid axis.

    x_ref: (tm, tk)  activations
    w_ref: (tk, tn)  weights, pre-transposed at init to (d_in, d_out)
    o_ref: (tm, tn)  output tile (written on the last K step only)
    acc_ref: (tm, tn) f32 accumulator scratch (resident across K steps)
    """
    k = pl.program_id(2)
    prod = jnp.dot(x_ref[...], w_ref[...], preferred_element_type=jnp.float32)

    @pl.when(k == 0)
    def _():
        acc_ref[...] = prod          # skip the zero-fill: write first partial

    @pl.when(k > 0)
    def _():
        acc_ref[...] += prod

    @pl.when(k == pl.num_programs(2) - 1)
    def _():
        o_ref[...] = acc_ref[...].astype(o_ref.dtype)


def _linear_kernel_single_k(x_ref, w_ref, o_ref):
    """Single-K-step specialization: no accumulator scratch needed."""
    o_ref[...] = jnp.dot(
        x_ref[...], w_ref[...], preferred_element_type=jnp.float32
    ).astype(o_ref.dtype)


# --------------------------------------------------------------------------
# forward (weights already prepared: transposed to (d_in, d_out) and padded)
# --------------------------------------------------------------------------
def _linear_forward(x, w_pad, *, d_in, d_out, n_p, k_p, tn, tk, tm_pref):
    lead = x.shape[:-1]
    m = int(math.prod(lead)) if lead else 1
    x2d = x.reshape(m, d_in)

    sub = _sublane(x.dtype)                      # dtype-aware sublane multiple
    tm = _pick_tile(m, tm_pref, sub)
    m_p = _round_up(m, tm)

    pad_m, pad_k = m_p - m, k_p - d_in
    if pad_m or pad_k:
        # Only the activations are padded per call; weight padding was hoisted
        # to init.  (Zero K/M padding contributes nothing to the matmul.)
        x2d = jnp.pad(x2d, ((0, pad_m), (0, pad_k)))

    out_dtype = jnp.result_type(x.dtype, w_pad.dtype)
    o_item = jnp.dtype(out_dtype).itemsize
    x_item = jnp.dtype(x2d.dtype).itemsize
    w_item = jnp.dtype(w_pad.dtype).itemsize

    grid_m, grid_n, grid_k = m_p // tm, n_p // tn, k_p // tk

    # Realistic HBM traffic: x is re-read once per N step, W once per M step.
    bytes_accessed = (
        m_p * k_p * x_item * grid_n
        + k_p * n_p * w_item * grid_m
        + m_p * n_p * o_item
    )
    cost = pl.CostEstimate(
        flops=2 * m_p * n_p * k_p, transcendentals=0, bytes_accessed=bytes_accessed
    )
    vmem_limit = _vmem_limit_bytes(tm, tn, tk, x_item, w_item, o_item, grid_k > 1)

    if grid_k == 1:
        # Fast path: whole K resident, write the dot result straight out.
        out2d = pl.pallas_call(
            _linear_kernel_single_k,
            out_shape=jax.ShapeDtypeStruct((m_p, n_p), out_dtype),
            grid_spec=pltpu.PrefetchScalarGridSpec(
                num_scalar_prefetch=0,
                grid=(grid_m, grid_n),
                in_specs=[
                    pl.BlockSpec((tm, tk), lambda i, j: (i, 0)),
                    pl.BlockSpec((tk, tn), lambda i, j: (0, j)),
                ],
                out_specs=pl.BlockSpec((tm, tn), lambda i, j: (i, j)),
            ),
            compiler_params=pltpu.CompilerParams(
                dimension_semantics=("parallel", "parallel"),
                vmem_limit_bytes=vmem_limit,
            ),
            cost_estimate=cost,
        )(x2d, w_pad)
    else:
        out2d = pl.pallas_call(
            _linear_kernel,
            out_shape=jax.ShapeDtypeStruct((m_p, n_p), out_dtype),
            grid_spec=pltpu.PrefetchScalarGridSpec(
                num_scalar_prefetch=0,
                grid=(grid_m, grid_n, grid_k),
                in_specs=[
                    pl.BlockSpec((tm, tk), lambda i, j, k: (i, k)),
                    pl.BlockSpec((tk, tn), lambda i, j, k: (k, j)),
                ],
                out_specs=pl.BlockSpec((tm, tn), lambda i, j, k: (i, j)),
                scratch_shapes=[pltpu.VMEM((tm, tn), jnp.float32)],
            ),
            # Both M and N exposed as parallel so megacore/v7x can shard either
            # axis; K (reduction) stays innermost and arbitrary.
            compiler_params=pltpu.CompilerParams(
                dimension_semantics=("parallel", "parallel", "arbitrary"),
                vmem_limit_bytes=vmem_limit,
            ),
            cost_estimate=cost,
        )(x2d, w_pad)

    out2d = out2d[:m, :d_out]
    return out2d.reshape(*lead, d_out)


# --------------------------------------------------------------------------
# public API
# --------------------------------------------------------------------------
def prepare_linear_weights(weights, tn_pref, tk_pref):
    """One-time weight re-layout: (d_out, d_in) -> padded (k_p, n_p)."""
    d_out, d_in = weights.shape
    tn = _pick_tile(d_out, tn_pref, 128)
    tk = _pick_tile(d_in, tk_pref, 128)
    n_p = _round_up(d_out, tn)
    k_p = _round_up(d_in, tk)
    w_t = weights.T                                    # (d_in, d_out)
    if (k_p, n_p) != (d_in, d_out):
        w_t = jnp.pad(w_t, ((0, k_p - d_in), (0, n_p - d_out)))
    return w_t, tn, tk, n_p, k_p


def make_linear(weights, *, tm=None, tn=None, tk=None):
    """Build a jitted forward fn with weight re-layout/padding hoisted to init."""
    d_out, d_in = weights.shape
    tm_d, tn_d, tk_d = _default_tile_prefs(weights.dtype)
    tm_pref = tm if tm is not None else tm_d
    tn_pref = tn if tn is not None else tn_d
    tk_pref = tk if tk is not None else tk_d

    w_pad, tn_eff, tk_eff, n_p, k_p = prepare_linear_weights(
        weights, tn_pref, tk_pref
    )
    fwd = jax.jit(
        functools.partial(
            _linear_forward,
            d_in=d_in, d_out=d_out, n_p=n_p, k_p=k_p,
            tn=tn_eff, tk=tk_eff, tm_pref=tm_pref,
        )
    )

    def apply(x):
        return fwd(x, w_pad)

    return apply


def linear_pallas(x, weights, *, tm=None, tn=None, tk=None):
    """One-shot convenience wrapper (re-prepares weights each call).

    Hot paths should use make_linear() so the weight transpose/pad happens once.
    """
    return make_linear(weights, tm=tm, tn=tn, tk=tk)(x)


def init_linear_weights(key, in_features: int, out_features: int, dtype=jnp.float32):
    # matches torch.nn.init.trunc_normal_(mean=0, std=_std, a=-3*_std, b=3*_std)
    std = (2.0 / (in_features + out_features)) ** 0.5
    w = jax.random.truncated_normal(
        key, -3.0, 3.0, (out_features, in_features), dtype=jnp.float32
    ) * std
    return w.astype(dtype)


# --------------------------------------------------------------------------
# self-test
# --------------------------------------------------------------------------
if __name__ == "__main__":
    key = jax.random.PRNGKey(0)
    k_w, k_x, k_w2, k_x2 = jax.random.split(key, 4)

    # --- Test 1: small shapes, single-K fast path (no accumulator scratch) ---
    in_f, out_f, batch, seq = 32, 64, 2, 8
    w = init_linear_weights(k_w, in_f, out_f)
    x = jax.random.normal(k_x, (batch, seq, in_f), dtype=jnp.float32)

    linear1 = make_linear(w)
    y = linear1(x)
    jax.block_until_ready(y)

    y_ref = jnp.einsum("...i,oi->...o", x, w, preferred_element_type=jnp.float32)
    assert y.shape == (batch, seq, out_f)
    assert jnp.allclose(y, y_ref, atol=2e-2, rtol=2e-2), float(
        jnp.max(jnp.abs(y - y_ref))
    )

    # --- Test 2: ragged dims + forced tiny tiles -> exercises the full
    #     (M, N, K) grid, f32 accumulator init/finalize, padding + slicing ---
    in2, out2, b2, s2 = 300, 200, 3, 7
    w2 = init_linear_weights(k_w2, in2, out2)
    x2 = jax.random.normal(k_x2, (b2, s2, in2), dtype=jnp.float32)

    linear2 = make_linear(w2, tm=16, tn=128, tk=128)
    y2 = linear2(x2)
    jax.block_until_ready(y2)

    y2_ref = jnp.einsum("...i,oi->...o", x2, w2, preferred_element_type=jnp.float32)
    assert y2.shape == (b2, s2, out2)
    assert jnp.allclose(y2, y2_ref, atol=2e-2, rtol=2e-2), float(
        jnp.max(jnp.abs(y2 - y2_ref))
    )

    print("KERNEL_OK")
</pallas_src>

<mosaic_0001>
module attributes {stable_mosaic.version = 11 : i64} {
  func.func @_linear_kernel_single_k(%arg0: i32, %arg1: i32, %arg2: memref<16x128xf32, #tpu.memory_space<vmem>>, %arg3: memref<128x128xf32, #tpu.memory_space<vmem>>, %arg4: memref<16x128xf32, #tpu.memory_space<vmem>>) attributes {dimension_semantics = [#tpu.dimension_semantics<parallel>, #tpu.dimension_semantics<parallel>], iteration_bounds = array<i64: 1, 1>, scalar_prefetch = 0 : i64, scratch_operands = 0 : i64, tpu.core_type = #tpu.core_type<tc>, window_params = [{transform_indices = @transform_0, window_bounds = array<i64: 16, 128>}, {transform_indices = @transform_1, window_bounds = array<i64: 128, 128>}, {transform_indices = @transform_2, window_bounds = array<i64: 16, 128>}]} {
    %c0 = arith.constant 0 : index
    %c0_0 = arith.constant 0 : index
    %0 = vector.load %arg2[%c0, %c0_0] : memref<16x128xf32, #tpu.memory_space<vmem>>, vector<16x128xf32>
    %c0_1 = arith.constant 0 : index
    %c0_2 = arith.constant 0 : index
    %1 = vector.load %arg3[%c0_1, %c0_2] : memref<128x128xf32, #tpu.memory_space<vmem>>, vector<128x128xf32>
    %cst = arith.constant dense<0.000000e+00> : vector<16x128xf32>
    %2 = tpu.matmul %0, %1, %cst {dimension_numbers = #tpu.dot_dimension_numbers<[1], [0], [0], [1], [0, 0, 1, 1], [], []>} : vector<16x128xf32>, vector<128x128xf32>, vector<16x128xf32> -> vector<16x128xf32>
    %c0_3 = arith.constant 0 : index
    %c0_4 = arith.constant 0 : index
    %3 = vector.load %arg4[%c0_3, %c0_4] : memref<16x128xf32, #tpu.memory_space<vmem>>, vector<16x128xf32>
    tpu.vector_store %arg4[%c0_3, %c0_4], %2 {strides = array<i32>} : memref<16x128xf32, #tpu.memory_space<vmem>>, vector<16x128xf32>,
    return
  }
  func.func @transform_0(%arg0: i32, %arg1: i32) -> (i32, i32) {
    %c0_i32 = arith.constant 0 : i32
    %c0_i32_0 = arith.constant 0 : i32
    return %arg0, %c0_i32 : i32, i32
  }
  func.func @transform_1(%arg0: i32, %arg1: i32) -> (i32, i32) {
    %c0_i32 = arith.constant 0 : i32
    %c0_i32_0 = arith.constant 0 : i32
    return %c0_i32, %arg1 : i32, i32
  }
  func.func @transform_2(%arg0: i32, %arg1: i32) -> (i32, i32) {
    %c0_i32 = arith.constant 0 : i32
    return %arg0, %arg1 : i32, i32
  }
}

</mosaic_0001>

<bundles_post_ra>
// kernel: _linear_forward.1
= control target key start
LH: loop header
LB: loop body
LE: loop exit
PB: predicated region body
PF: predicated region fallthrough
CT: control target
= control target key end

     0   :  { %7 = vsyncpa [#allocation3], 0  ;;  %s120_s12 = smov [#allocation2]   ;;  %s121_s14 = smov 128   ;;  %s153_s0 = inlined_call_operand.vmem [shape: f32[16,128], index: 0, kind: input, shape index: {}]   ;;  %s154_s1 = inlined_call_operand.hbm [shape: f32[128,128], index: 1, kind: input, shape index: {}]   ;;  %s155_s2 = inlined_call_operand.vmem [shape: f32[16,128], index: 2, kind: output, shape index: {}]  }
   0x1   :  { %s14_s11 = sshll.u32 %s154_s1, 4  ;;  %s16_s13 = sshll.u32 %s120_s12, 4  ;;  %s15_s11 = int_to_ptr.hbm [resolvable:$true] %s14_s11  ;;  %s17_s13 = int_to_ptr.vmem [resolvable:$true] %s16_s13 }
   0x2   :  { %s122_s15 = smov 8  }
   0x3   :  { %22 = dma.hbm_to_vmem [thread:$0]  %s15_s11, 2048, %s17_s13, [#allocation3], %s121_s14, %s121_s14, %s122_s15  }
   0x4   :  { %118 = dma.done.wait [#allocation3], 2048  }
   0x5   :  { %119 = vsyncadd [#allocation3], 4294965248  ;;  %v44_v0 = vld [vmem:[#allocation2 + $0x78] sm:$0xff]  ;;  %v43_v1 = vld [vmem:[#allocation2 + $0x70] sm:$0xff] }
   0x6   :  { %45 = vmatpush.msra.mxu0 %v44_v0  ;;  %75 = vmatpush.msra.mxu1 %v44_v0  ;;  %v42_v2 = vld [vmem:[#allocation2 + $0x68] sm:$0xff]  ;;  %v41_v3 = vld [vmem:[#allocation2 + $0x60] sm:$0xff]  ;;  %v40_v4 = vld [vmem:[#allocation2 + $0x58] sm:$0xff] }
   0x7   :  { %v39_v5 = vld [vmem:[#allocation2 + $0x50] sm:$0xff]  ;;  %v38_v6 = vld [vmem:[#allocation2 + $0x48] sm:$0xff]  ;;  %v37_v7 = vld [vmem:[#allocation2 + $0x40] sm:$0xff] }
   0x8   :  { %46 = vmatpush.msra.mxu0 %v43_v1  ;;  %76 = vmatpush.msra.mxu1 %v43_v1  ;;  %v36_v8 = vld [vmem:[#allocation2 + $0x38] sm:$0xff]  ;;  %v35_v9 = vld [vmem:[#allocation2 + $0x30] sm:$0xff]  ;;  %v34_v10 = vld [vmem:[#allocation2 + $0x28] sm:$0xff] }
   0x9   :  { %v33_v11 = vld [vmem:[#allocation2 + $0x20] sm:$0xff]  ;;  %v32_v12 = vld [vmem:[#allocation2 + $0x18] sm:$0xff]  ;;  %v31_v13 = vld [vmem:[#allocation2 + $0x10] sm:$0xff] }
   0xa   :  { %47 = vmatpush.msra.mxu0 %v42_v2  ;;  %77 = vmatpush.msra.mxu1 %v42_v2  ;;  %v30_v14 = vld [vmem:[#allocation2 + $0x8] sm:$0xff]  ;;  %v29_v15 = vld [vmem:[#allocation2] sm:$0xff] }
   0xb   :  { %v27_v16 = vld [vmem:[%s153_s0] sm:$0xff]  ;;  %v28_v17 = vld [vmem:[%s153_s0 + $0x8] sm:$0xff] }
   0xc   :  { %48 = vmatpush.msra.mxu0 %v41_v3  ;;  %78 = vmatpush.msra.mxu1 %v41_v3 }
   0xe   :  { %49 = vmatpush.msra.mxu0 %v40_v4  ;;  %79 = vmatpush.msra.mxu1 %v40_v4 }
  0x10   :  { %50 = vmatpush.msra.mxu0 %v39_v5  ;;  %80 = vmatpush.msra.mxu1 %v39_v5 }
  0x12   :  { %51 = vmatpush.msra.mxu0 %v38_v6  ;;  %81 = vmatpush.msra.mxu1 %v38_v6 }
  0x14   :  { %52 = vmatpush.msra.mxu0 %v37_v7  ;;  %82 = vmatpush.msra.mxu1 %v37_v7 }
  0x16   :  { %53 = vmatpush.msra.mxu0 %v36_v8  ;;  %83 = vmatpush.msra.mxu1 %v36_v8 }
  0x18   :  { %54 = vmatpush.msra.mxu0 %v35_v9  ;;  %84 = vmatpush.msra.mxu1 %v35_v9 }
  0x1a   :  { %55 = vmatpush.msra.mxu0 %v34_v10  ;;  %85 = vmatpush.msra.mxu1 %v34_v10 }
  0x1c   :  { %56 = vmatpush.msra.mxu0 %v33_v11  ;;  %86 = vmatpush.msra.mxu1 %v33_v11 }
  0x1e   :  { %57 = vmatpush.msra.mxu0 %v32_v12  ;;  %87 = vmatpush.msra.mxu1 %v32_v12 }
  0x20   :  { %58 = vmatpush.msra.mxu0 %v31_v13  ;;  %88 = vmatpush.msra.mxu1 %v31_v13 }
  0x22   :  { %59 = vmatpush.msra.mxu0 %v30_v14  ;;  %89 = vmatpush.msra.mxu1 %v30_v14 }
  0x24   :  { %60 = vmatpush.msra.mxu0 %v29_v15  ;;  %90 = vmatpush.msra.mxu1 %v29_v15 }
  0x25   :  { %61 = vmatmul.f32.vlgmr.msra.gmra.mxu0 %v27_v16  ;;  %64 = vmatmul.f32.vlgmr.msra.gmra.mxu1 %v28_v17 }
  0xa2   :  { %v62_v18 = vpop.f32.mrf.mxu0  ;;  %v65_v19 = vpop.f32.mrf.mxu1 }
  0xa3   :  { %68 = vst [vmem:[%s155_s2] sm:$0xff] %v62_v18 }
  0xa4   :  { %69 = vst [vmem:[%s155_s2 + $0x8] sm:$0xff] %v65_v19 }
  0xa5   :  { %74 = vsyncpa [#allocation3], 1 }

</bundles_post_ra>
